<compile_context>
chip_gen: v5e
topology: v5e:2x2
jax: 0.10.0
libtpu: 0.0.40
codegen_flags: <defaults>
</compile_context>

<pallas_src>
import functools

import jax
import jax.numpy as jnp
from jax.experimental import pallas as pl
from jax.experimental.pallas import tpu as pltpu

_LANE = 128
_MAX_TILE_LANES = 8192


def _dice_partial_kernel(pred_ref, tgt_ref, num_ref, den_ref, *,
                         ignore_index, hw, tile, tiles_per_shard, last_full,
                         ragged):
    shard = pl.program_id(0)
    h = pl.program_id(1)
    t_idx = shard * tiles_per_shard + h        # logical tile index (may overflow)

    @pl.when(h == 0)
    def _init():
        num_ref[...] = jnp.zeros_like(num_ref)
        den_ref[...] = jnp.zeros_like(den_ref)

    def fold_lanes(a):
        # (N, C, tile) -> (N, C, 128): tree-sum 128-aligned lane-tiles.
        # Pure VALU vreg adds; the final 128->1 reduce happens in JAX finalize.
        k = tile // _LANE
        parts = [a[:, :, j * _LANE:(j + 1) * _LANE] for j in range(k)]
        while len(parts) > 1:
            nxt = [parts[i] + parts[i + 1] for i in range(0, len(parts) - 1, 2)]
            if len(parts) % 2:
                nxt.append(parts[-1])
            parts = nxt
        return parts[0]

    def accumulate(masked):
        x = pred_ref[...].astype(jnp.float32)          # (N, C, T)
        N, C, T = x.shape
        # Numerically stable softmax over the class (sublane) axis.  The divide
        # is an EUP approx reciprocal + one Newton step on the (N, 1, T) sum.
        m = jnp.max(x, axis=1, keepdims=True)
        e = jnp.exp(x - m)
        s = jnp.sum(e, axis=1, keepdims=True)
        r = pl.reciprocal(s, approx=True)
        r = r * (2.0 - s * r)                          # Newton step: ~1e-7 rel err
        p = e * r                                      # softmax probs (N, C, T)

        t = tgt_ref[...].astype(jnp.int32)             # (N, T) labels, any int dtype
        clamped = jnp.clip(t, 0, C - 1)
        valid = t != ignore_index
        cls_ids = jax.lax.broadcasted_iota(jnp.int32, (1, C, T), 1)

        if masked:
            # Ragged / overflow tile: lanes whose global column >= HW hold
            # undefined data -> mask them out of numerator AND denominator.
            col = t_idx * tile + jax.lax.broadcasted_iota(jnp.int32, (1, T), 1)
            in_bounds = col < hw
            t_num = jnp.where(valid & in_bounds, clamped, -1)
            t_den = jnp.where(in_bounds, clamped, -1)
            p_sq = jnp.where(in_bounds[:, None, :], p * p, 0.0)
        else:
            # Full tile (common case): no per-element bounds masking.
            t_num = jnp.where(valid, clamped, -1)
            t_den = clamped
            p_sq = p * p

        # Numerator is valid-masked via t_num == -1; the denominator is NOT
        # valid-masked and ignored pixels count towards class C-1 (matches the
        # reference).  one_hot**2 == one_hot, so it is added without squaring.
        num_c = jnp.where(t_num[:, None, :] == cls_ids, p, 0.0)
        den_c = p_sq + jnp.where(t_den[:, None, :] == cls_ids, 1.0, 0.0)
        num_ref[...] += fold_lanes(num_c).reshape(num_ref.shape)
        den_ref[...] += fold_lanes(den_c).reshape(den_ref.shape)

    if ragged:
        @pl.when(t_idx < last_full)
        def _full_tile():
            accumulate(False)

        @pl.when(t_idx >= last_full)
        def _ragged_tile():
            accumulate(True)
    else:
        accumulate(False)


def _round_down(x, m):
    return (x // m) * m


def dice_loss_pallas(pred, target, *, smooth=1.0, exponent=2, loss_weight=1.0,
                     ignore_index=255, max_tile_lanes=None):
    """pred: (N, C, H, W) float logits (NCHW); target: (N, H, W) integer labels."""
    # TODO(synk): only exponent == 2 and class_weight=None (the module defaults)
    # are implemented in the kernel.
    assert exponent == 2
    N, C, H, W = pred.shape
    HW = H * W

    pred2 = pred.reshape(N, C, HW)          # free reshape, keep native dtype
    tgt2 = target.reshape(N, HW)            # native dtype (int32 / int16 / uint8)

    # ---- per-generation VMEM budget & tile selection ------------------------
    phys_vmem = 64 << 20                    # v7x-safe fallback
    try:
        info = pltpu.get_tpu_info()
        phys_vmem = int(getattr(info, "vmem_capacity_bytes", None) or phys_vmem)
    except Exception:
        pass
    budget = min(phys_vmem // 2, 40 << 20)  # ~32 MiB on v7x, 40 MiB on v5e/v6e

    pred_isz = jnp.dtype(pred.dtype).itemsize
    tgt_isz = jnp.dtype(target.dtype).itemsize
    # double-buffered input blocks + ~6 live f32 (N, C, tile) temporaries, per lane
    bytes_per_lane = 2 * (N * C * pred_isz + N * tgt_isz) + 6 * N * C * 4
    fixed_bytes = 4 * N * C * _LANE * 4 + (2 << 20)   # outputs (x2, dbl-buf) + slack

    cap = max_tile_lanes if max_tile_lanes is not None else _MAX_TILE_LANES
    cap = max(_LANE, _round_down(cap, _LANE))
    hw_lanes = -(-HW // _LANE) * _LANE                 # HW rounded up to a lane tile
    tile = _round_down(max(budget - fixed_bytes, 0) // bytes_per_lane, _LANE)
    tile = max(_LANE, min(tile, cap, hw_lanes))

    total_tiles = -(-HW // tile)
    num_shards = 2 if total_tiles >= 2 else 1          # 2 TCs on v7x; cheap elsewhere
    tiles_per_shard = -(-total_tiles // num_shards)
    has_overflow = num_shards * tiles_per_shard != total_tiles
    ragged = has_overflow or (HW % tile != 0)
    last_full = HW // tile                             # logical tiles fully in bounds
    last_block = total_tiles - 1

    if has_overflow:
        # Overflow grid steps re-read the last real block; their contribution is
        # fully masked inside the kernel (global column >= HW).
        pred_map = lambda s, h: (0, 0, jnp.minimum(s * tiles_per_shard + h, last_block))
        tgt_map = lambda s, h: (0, jnp.minimum(s * tiles_per_shard + h, last_block))
    else:
        pred_map = lambda s, h: (0, 0, s * tiles_per_shard + h)
        tgt_map = lambda s, h: (0, s * tiles_per_shard + h)

    vmem_est = tile * bytes_per_lane + fixed_bytes
    vmem_limit = int(min(phys_vmem * 3 // 4, max(32 << 20, vmem_est + (8 << 20))))

    kernel = functools.partial(
        _dice_partial_kernel, ignore_index=int(ignore_index), hw=HW, tile=tile,
        tiles_per_shard=tiles_per_shard, last_full=last_full, ragged=ragged)

    num_part, den_part = pl.pallas_call(
        kernel,
        out_shape=(jax.ShapeDtypeStruct((num_shards, N, C, _LANE), jnp.float32),
                   jax.ShapeDtypeStruct((num_shards, N, C, _LANE), jnp.float32)),
        grid=(num_shards, tiles_per_shard),
        in_specs=[
            pl.BlockSpec((N, C, tile), pred_map),
            pl.BlockSpec((N, tile), tgt_map),
        ],
        out_specs=(
            pl.BlockSpec((1, N, C, _LANE), lambda s, h: (s, 0, 0, 0)),
            pl.BlockSpec((1, N, C, _LANE), lambda s, h: (s, 0, 0, 0)),
        ),
        compiler_params=pltpu.CompilerParams(
            dimension_semantics=("parallel", "arbitrary"),
            vmem_limit_bytes=vmem_limit),
    )(pred2, tgt2)

    # Tiny finalize in plain JAX: 128->1 lane reduce + shard reduce + dice.
    num = jnp.sum(num_part, axis=(0, 3))               # (N, C)
    den = jnp.sum(den_part, axis=(0, 3))               # (N, C)
    per_class = 1.0 - (2.0 * num + smooth) / (den + smooth)
    if 0 <= ignore_index < C:
        # Reference skips the class equal to ignore_index (still divides by C).
        per_class = per_class.at[:, ignore_index].set(0.0)
    loss_per_sample = jnp.sum(per_class, axis=1) / C
    return loss_weight * jnp.mean(loss_per_sample)


def dice_loss_ref(pred, target, *, smooth=1.0, exponent=2, loss_weight=1.0,
                  ignore_index=255):
    """Pure-JAX reference mirroring the PyTorch module."""
    N, C, H, W = pred.shape
    p = jax.nn.softmax(pred.astype(jnp.float32), axis=1)
    oh = jax.nn.one_hot(jnp.clip(target.astype(jnp.int32), 0, C - 1), C,
                        dtype=jnp.float32)             # (N, H, W, C)
    valid = (target.astype(jnp.int32) != ignore_index).astype(jnp.float32).reshape(N, -1)
    total = jnp.zeros((N,), jnp.float32)
    for i in range(C):
        if i == ignore_index:
            continue
        pr = p[:, i].reshape(N, -1)
        tg = oh[..., i].reshape(N, -1)
        num = jnp.sum(pr * tg * valid, axis=1) * 2 + smooth
        de = jnp.sum(pr ** exponent + tg ** exponent, axis=1) + smooth
        total = total + (1.0 - num / de)
    loss = loss_weight * total / C
    return jnp.mean(loss)


if __name__ == "__main__":
    key = jax.random.PRNGKey(0)
    k1, k2, k3, k4 = jax.random.split(key, 4)

    # Case 1: module-default small shape (N, C, H, W) = (2, 4, 16, 16), f32.
    N, C, H, W = 2, 4, 16, 16
    pred = jax.random.normal(k1, (N, C, H, W), dtype=jnp.float32)
    target = jax.random.randint(k2, (N, H, W), 0, C, dtype=jnp.int32)
    target = target.at[:, 0, 0:3].set(255)             # exercise the valid mask
    out = jax.block_until_ready(dice_loss_pallas(pred, target))
    ref = dice_loss_ref(pred, target)
    assert jnp.allclose(out, ref, atol=1e-5, rtol=1e-5), (out, ref)

    # Case 2: bf16 logits, int16 labels, ragged HW and forced tiny tiles ->
    # exercises the masked last block, multi-tile accumulation, the 2-shard
    # split and the fully-masked overflow tile.
    N, C, H, W = 2, 4, 24, 24
    pred = jax.random.normal(k3, (N, C, H, W), dtype=jnp.bfloat16)
    target = jax.random.randint(k4, (N, H, W), 0, C, dtype=jnp.int32)
    target = target.at[:, 1, 2:7].set(255)
    target = target.astype(jnp.int16)                  # narrow label DMA path
    out = jax.block_until_ready(dice_loss_pallas(pred, target, max_tile_lanes=128))
    ref = dice_loss_ref(pred, target)
    assert jnp.allclose(out, ref, atol=1e-4, rtol=1e-4), (out, ref)

    print("KERNEL_OK")
</pallas_src>

<mosaic_0001>
module attributes {stable_mosaic.version = 11 : i64} {
  func.func @_dice_partial_kernel(%arg0: i32, %arg1: i32, %arg2: memref<2x4x256xf32, #tpu.memory_space<vmem>>, %arg3: memref<2x256xi32, #tpu.memory_space<vmem>>, %arg4: memref<1x2x4x128xf32, #tpu.memory_space<vmem>>, %arg5: memref<1x2x4x128xf32, #tpu.memory_space<vmem>>) attributes {dimension_semantics = [#tpu.dimension_semantics<parallel>, #tpu.dimension_semantics<arbitrary>], iteration_bounds = array<i64: 1, 1>, scalar_prefetch = 0 : i64, scratch_operands = 0 : i64, tpu.core_type = #tpu.core_type<tc>, window_params = [{transform_indices = @transform_0, window_bounds = array<i64: 2, 4, 256>}, {transform_indices = @transform_1, window_bounds = array<i64: 2, 256>}, {transform_indices = @transform_2, window_bounds = array<i64: 1, 2, 4, 128>}, {transform_indices = @transform_3, window_bounds = array<i64: 1, 2, 4, 128>}]} {
    %c0_i32 = arith.constant 0 : i32
    %0 = arith.cmpi eq, %arg1, %c0_i32 : i32
    %1 = arith.extui %0 : i1 to i32
    %c0_i32_0 = arith.constant 0 : i32
    %2 = arith.cmpi ne, %1, %c0_i32_0 : i32
    scf.if %2 {
      %cst_27 = arith.constant 0.000000e+00 : f32
      %57 = vector.broadcast %cst_27 : f32 to vector<1x2x4x128xf32>
      %c0_28 = arith.constant 0 : index
      %c0_29 = arith.constant 0 : index
      %c0_30 = arith.constant 0 : index
      %c0_31 = arith.constant 0 : index
      %58 = vector.load %arg4[%c0_28, %c0_29, %c0_30, %c0_31] : memref<1x2x4x128xf32, #tpu.memory_space<vmem>>, vector<1x2x4x128xf32>
      tpu.vector_store %arg4[%c0_28, %c0_29, %c0_30, %c0_31], %57 {strides = array<i32>} : memref<1x2x4x128xf32, #tpu.memory_space<vmem>>, vector<1x2x4x128xf32>,
      %cst_32 = arith.constant 0.000000e+00 : f32
      %59 = vector.broadcast %cst_32 : f32 to vector<1x2x4x128xf32>
      %c0_33 = arith.constant 0 : index
      %c0_34 = arith.constant 0 : index
      %c0_35 = arith.constant 0 : index
      %c0_36 = arith.constant 0 : index
      %60 = vector.load %arg5[%c0_33, %c0_34, %c0_35, %c0_36] : memref<1x2x4x128xf32, #tpu.memory_space<vmem>>, vector<1x2x4x128xf32>
      tpu.vector_store %arg5[%c0_33, %c0_34, %c0_35, %c0_36], %59 {strides = array<i32>} : memref<1x2x4x128xf32, #tpu.memory_space<vmem>>, vector<1x2x4x128xf32>,
    } else {
    }
    %c0 = arith.constant 0 : index
    %c0_1 = arith.constant 0 : index
    %c0_2 = arith.constant 0 : index
    %3 = vector.load %arg2[%c0, %c0_1, %c0_2] : memref<2x4x256xf32, #tpu.memory_space<vmem>>, vector<2x4x256xf32>
    %cst = arith.constant dense<0xFF800000> : vector<2x256xf32>
    %4 = vector.multi_reduction <maximumf>, %3, %cst [1] : vector<2x4x256xf32> to vector<2x256xf32>
    %5 = vector.shape_cast %4 : vector<2x256xf32> to vector<2x1x256xf32>
    %6 = vector.broadcast %5 : vector<2x1x256xf32> to vector<2x4x256xf32>
    %7 = arith.subf %3, %6 : vector<2x4x256xf32>
    %8 = math.exp %7 : vector<2x4x256xf32>
    %cst_3 = arith.constant dense<0.000000e+00> : vector<2x256xf32>
    %9 = vector.multi_reduction <add>, %8, %cst_3 [1] : vector<2x4x256xf32> to vector<2x256xf32>
    %10 = vector.shape_cast %9 : vector<2x256xf32> to vector<2x1x256xf32>
    %11 = tpu.reciprocal %10 {approx = true} : vector<2x1x256xf32> -> vector<2x1x256xf32>
    %12 = arith.mulf %10, %11 : vector<2x1x256xf32>
    %cst_4 = arith.constant 2.000000e+00 : f32
    %13 = vector.broadcast %cst_4 : f32 to vector<2x1x256xf32>
    %14 = arith.subf %13, %12 : vector<2x1x256xf32>
    %15 = arith.mulf %11, %14 : vector<2x1x256xf32>
    %16 = vector.broadcast %15 : vector<2x1x256xf32> to vector<2x4x256xf32>
    %17 = arith.mulf %8, %16 : vector<2x4x256xf32>
    %c0_5 = arith.constant 0 : index
    %c0_6 = arith.constant 0 : index
    %18 = vector.load %arg3[%c0_5, %c0_6] : memref<2x256xi32, #tpu.memory_space<vmem>>, vector<2x256xi32>
    %c0_i32_7 = arith.constant 0 : i32
    %c3_i32 = arith.constant 3 : i32
    %19 = vector.broadcast %c0_i32_7 : i32 to vector<2x256xi32>
    %20 = arith.maxsi %19, %18 : vector<2x256xi32>
    %21 = vector.broadcast %c3_i32 : i32 to vector<2x256xi32>
    %22 = arith.minsi %21, %20 : vector<2x256xi32>
    %c255_i32 = arith.constant 255 : i32
    %23 = vector.broadcast %c255_i32 : i32 to vector<2x256xi32>
    %24 = arith.cmpi ne, %18, %23 : vector<2x256xi32>
    %25 = tpu.iota {dimensions = array<i32: 1>} : vector<1x4x256xi32>
    %c-1_i32 = arith.constant -1 : i32
    %26 = vector.broadcast %c-1_i32 : i32 to vector<2x256xi32>
    %27 = arith.select %24, %22, %26 : vector<2x256xi1>, vector<2x256xi32>
    %28 = arith.mulf %17, %17 : vector<2x4x256xf32>
    %29 = vector.shape_cast %27 : vector<2x256xi32> to vector<2x1x256xi32>
    %30 = vector.broadcast %29 : vector<2x1x256xi32> to vector<2x4x256xi32>
    %31 = vector.broadcast %25 : vector<1x4x256xi32> to vector<2x4x256xi32>
    %32 = arith.cmpi eq, %30, %31 : vector<2x4x256xi32>
    %cst_8 = arith.constant 0.000000e+00 : f32
    %33 = vector.broadcast %cst_8 : f32 to vector<2x4x256xf32>
    %34 = arith.select %32, %17, %33 : vector<2x4x256xi1>, vector<2x4x256xf32>
    %35 = vector.shape_cast %22 : vector<2x256xi32> to vector<2x1x256xi32>
    %36 = vector.broadcast %35 : vector<2x1x256xi32> to vector<2x4x256xi32>
    %37 = vector.broadcast %25 : vector<1x4x256xi32> to vector<2x4x256xi32>
    %38 = arith.cmpi eq, %36, %37 : vector<2x4x256xi32>
    %cst_9 = arith.constant 1.000000e+00 : f32
    %cst_10 = arith.constant 0.000000e+00 : f32
    %39 = vector.broadcast %cst_9 : f32 to vector<2x4x256xf32>
    %40 = vector.broadcast %cst_10 : f32 to vector<2x4x256xf32>
    %41 = arith.select %38, %39, %40 : vector<2x4x256xi1>, vector<2x4x256xf32>
    %42 = arith.addf %28, %41 : vector<2x4x256xf32>
    %c0_11 = arith.constant 0 : index
    %c0_12 = arith.constant 0 : index
    %c0_13 = arith.constant 0 : index
    %c0_14 = arith.constant 0 : index
    %43 = vector.load %arg4[%c0_11, %c0_12, %c0_13, %c0_14] : memref<1x2x4x128xf32, #tpu.memory_space<vmem>>, vector<1x2x4x128xf32>
    %44 = vector.extract_strided_slice %34 {offsets = [0, 0, 0], sizes = [2, 4, 128], strides = [1, 1, 1]} : vector<2x4x256xf32> to vector<2x4x128xf32>
    %45 = vector.extract_strided_slice %34 {offsets = [0, 0, 128], sizes = [2, 4, 128], strides = [1, 1, 1]} : vector<2x4x256xf32> to vector<2x4x128xf32>
    %46 = arith.addf %44, %45 : vector<2x4x128xf32>
    %47 = vector.shape_cast %46 : vector<2x4x128xf32> to vector<1x2x4x128xf32>
    %48 = arith.addf %43, %47 : vector<1x2x4x128xf32>
    %c0_15 = arith.constant 0 : index
    %c0_16 = arith.constant 0 : index
    %c0_17 = arith.constant 0 : index
    %c0_18 = arith.constant 0 : index
    %49 = vector.load %arg4[%c0_15, %c0_16, %c0_17, %c0_18] : memref<1x2x4x128xf32, #tpu.memory_space<vmem>>, vector<1x2x4x128xf32>
    tpu.vector_store %arg4[%c0_15, %c0_16, %c0_17, %c0_18], %48 {strides = array<i32>} : memref<1x2x4x128xf32, #tpu.memory_space<vmem>>, vector<1x2x4x128xf32>,
    %c0_19 = arith.constant 0 : index
    %c0_20 = arith.constant 0 : index
    %c0_21 = arith.constant 0 : index
    %c0_22 = arith.constant 0 : index
    %50 = vector.load %arg5[%c0_19, %c0_20, %c0_21, %c0_22] : memref<1x2x4x128xf32, #tpu.memory_space<vmem>>, vector<1x2x4x128xf32>
    %51 = vector.extract_strided_slice %42 {offsets = [0, 0, 0], sizes = [2, 4, 128], strides = [1, 1, 1]} : vector<2x4x256xf32> to vector<2x4x128xf32>
    %52 = vector.extract_strided_slice %42 {offsets = [0, 0, 128], sizes = [2, 4, 128], strides = [1, 1, 1]} : vector<2x4x256xf32> to vector<2x4x128xf32>
    %53 = arith.addf %51, %52 : vector<2x4x128xf32>
    %54 = vector.shape_cast %53 : vector<2x4x128xf32> to vector<1x2x4x128xf32>
    %55 = arith.addf %50, %54 : vector<1x2x4x128xf32>
    %c0_23 = arith.constant 0 : index
    %c0_24 = arith.constant 0 : index
    %c0_25 = arith.constant 0 : index
    %c0_26 = arith.constant 0 : index
    %56 = vector.load %arg5[%c0_23, %c0_24, %c0_25, %c0_26] : memref<1x2x4x128xf32, #tpu.memory_space<vmem>>, vector<1x2x4x128xf32>
    tpu.vector_store %arg5[%c0_23, %c0_24, %c0_25, %c0_26], %55 {strides = array<i32>} : memref<1x2x4x128xf32, #tpu.memory_space<vmem>>, vector<1x2x4x128xf32>,
    return
  }
  func.func @transform_0(%arg0: i32, %arg1: i32) -> (i32, i32, i32) {
    %c1_i32 = arith.constant 1 : i32
    %0 = arith.muli %arg0, %c1_i32 : i32
    %1 = arith.addi %0, %arg1 : i32
    %c0_i32 = arith.constant 0 : i32
    %c0_i32_0 = arith.constant 0 : i32
    %c0_i32_1 = arith.constant 0 : i32
    return %c0_i32, %c0_i32_0, %1 : i32, i32, i32
  }
  func.func @transform_1(%arg0: i32, %arg1: i32) -> (i32, i32) {
    %c1_i32 = arith.constant 1 : i32
    %0 = arith.muli %arg0, %c1_i32 : i32
    %1 = arith.addi %0, %arg1 : i32
    %c0_i32 = arith.constant 0 : i32
    %c0_i32_0 = arith.constant 0 : i32
    return %c0_i32, %1 : i32, i32
  }
  func.func @transform_2(%arg0: i32, %arg1: i32) -> (i32, i32, i32, i32) {
    %c0_i32 = arith.constant 0 : i32
    %c0_i32_0 = arith.constant 0 : i32
    %c0_i32_1 = arith.constant 0 : i32
    %c0_i32_2 = arith.constant 0 : i32
    return %arg0, %c0_i32, %c0_i32_0, %c0_i32_1 : i32, i32, i32, i32
  }
  func.func @transform_3(%arg0: i32, %arg1: i32) -> (i32, i32, i32, i32) {
    %c0_i32 = arith.constant 0 : i32
    %c0_i32_0 = arith.constant 0 : i32
    %c0_i32_1 = arith.constant 0 : i32
    %c0_i32_2 = arith.constant 0 : i32
    return %arg0, %c0_i32, %c0_i32_0, %c0_i32_1 : i32, i32, i32, i32
  }
}

</mosaic_0001>

<bundles_post_ra>
// kernel: tpu_custom_call.1
= control target key start
LH: loop header
LB: loop body
LE: loop exit
PB: predicated region body
PF: predicated region fallthrough
CT: control target
= control target key end

     0   :  { %9 = vsyncpa [#allocation3], 0  ;;  %s585_s0 = inlined_call_operand.hbm [shape: f32[2,4,256], index: 0, kind: input, shape index: {}]   ;;  %s586_s1 = inlined_call_operand.hbm [shape: s32[2,256], index: 1, kind: input, shape index: {}]   ;;  %s587_s2 = inlined_call_operand.hbm [shape: f32[1,2,4,128], index: 2, kind: output, shape index: {0}]   ;;  %s588_s3 = inlined_call_operand.hbm [shape: f32[1,2,4,128], index: 3, kind: output, shape index: {1}]  }
   0x1   :  { %10 = vsyncpa [#allocation6], 0 }
   0x2   :  { %11 = vsyncpa [#allocation4], 0 }
   0x3   :  { %12 = vsyncpa [#allocation9], 0  ;;  %s21_s14 = sshll.u32 %s585_s0, 4  ;;  %s465_s15 = smov [#allocation2]   ;;  %s22_s14 = int_to_ptr.hbm [resolvable:$true] %s21_s14 }
   0x4   :  { %s23_s16 = sshll.u32 %s465_s15, 4  ;;  %s39_s19 = sshll.u32 %s586_s1, 4  ;;  %s24_s16 = int_to_ptr.vmem [resolvable:$true] %s23_s16  ;;  %s40_s19 = int_to_ptr.hbm [resolvable:$true] %s39_s19 }
   0x5   :  { %s466_s20 = smov 128   ;;  %s467_s21 = smov 8  }
   0x6   :  { %29 = dma.hbm_to_vmem [thread:$0]  %s22_s14, 256, %s24_s16, [#allocation3], %s466_s20, %s466_s20, %s467_s21  }
   0x7   :  { %s468_s22 = smov [#allocation5]  }
   0x8   :  { %s41_s23 = sshll.u32 %s468_s22, 4  ;;  %s42_s23 = int_to_ptr.vmem [resolvable:$true] %s41_s23 }
   0x9   :  { %44 = dma.hbm_to_vmem [thread:$0]  %s40_s19, 64, %s42_s23, [#allocation6]  }
   0xa   :  { %457 = dma.done.wait [#allocation3], 256  }
   0xb   :  { %458 = vsyncadd [#allocation3], 4294967040 }
   0xc   :  { %459 = dma.done.wait [#allocation6], 64  }
   0xd   :  { %460 = vsyncadd [#allocation6], 4294967232  ;;  %v65_v0 = vld [vmem:[#allocation2] sm:$0xff]  ;;  %v66_v1 = vld [vmem:[#allocation2 + $0x8] sm:$0xff]  ;;  %vm80_vm0 = vcmask 1043456   ;;  %v469_v2 = vmov 0.0  }
   0xe   :  { %69 = vst [vmem:[#allocation1] ss:$2 sm:$0xff] %v65_v0  ;;  %v510_v43 = vld [vmem:[#allocation5] sm:$0xf]  ;;  %vm214_vm3 = vcmask 1041409   ;;  %vm216_vm4 = vcmask 1043459  }
   0xf   :  { %73 = vst [vmem:[#allocation1 + $0x10] ss:$2 sm:$0xff] %v66_v1  ;;  %vm195_vm1 = vcmp.gt.s32.totalorder %v510_v43, 0  ;;  %vm208_vm5 = vcmask 1040384   ;;  %vm210_vm6 = vcmask 1042434   ;;  %vm218_vm7 = vcmask 1042433  }
  0x10   :  { %63 = vst [vmem:[#allocation8] sm:$0xf] %v469_v2  ;;  %v196_v45 = vsel %vm195_vm1, %v510_v43, 0  ;;  %vm212_vm8 = vcmask 1041408   ;;  %vm199_vm9 = vcmp.ne.s32.totalorder %v510_v43, 255  ;;  %s470_s0 = smov [#allocation7]  }
  0x11   :  { %61 = vst [vmem:[#allocation7] sm:$0xf] %v469_v2  ;;  %vm197_vm2 = vcmp.lt.s32.totalorder %v196_v45, 3  ;;  %s563_s1 = sshll.u32 %s470_s0, 4  ;;  %s308_s26 = sshll.u32 %s587_s2, 4  ;;  %s307_s1 = int_to_ptr.vmem [resolvable:$true] %s563_s1  ;;  %s309_s26 = int_to_ptr.hbm [resolvable:$true] %s308_s26 }
  0x12   :  { %62 = vst [vmem:[#allocation7 + $0x4] sm:$0xf] %v469_v2  ;;  %v198_v47 = vsel %vm197_vm2, %v196_v45, 3  ;;  %s471_s27 = smov [#allocation8]   ;;  %s321_s4 = sshll.u32 %s588_s3, 4  ;;  %s322_s4 = int_to_ptr.hbm [resolvable:$true] %s321_s4 }
  0x13   :  { %64 = vst [vmem:[#allocation8 + $0x4] sm:$0xf] %v469_v2  ;;  %v246_v57 = vrot.slane %v198_v47, 1  ;;  %v247_v58 = vrot.slane %v198_v47, 2  ;;  %s568_s28 = sshll.u32 %s471_s27, 4  ;;  %s472_s6 = smov 64   ;;  %s320_s28 = int_to_ptr.vmem [resolvable:$true] %s568_s28 }
  0x14   :  { %s473_s7 = smov 4  }
  0x15   :  { %v70_v3 = vld.sshfl [vmem:[#allocation1] sm:$0xff pattern:$0x75316420]  ;;  %v71_v4 = vld.sshfl [vmem:[#allocation1 + $0x8] sm:$0xff pattern:$0x75316420] }
  0x16   :  { %v81_v5 = vsel %vm80_vm0, %v70_v3, -inf  ;;  %v88_v6 = vsel %vm80_vm0, %v71_v4, -inf  ;;  %v74_v7 = vld.sshfl [vmem:[#allocation1 + $0x10] sm:$0xff pattern:$0x75316420] }
  0x17   :  { %v82_v8 = vrot.slane %v81_v5, 4  ;;  %v89_v9 = vrot.slane %v88_v6, 4  ;;  %v75_v10 = vld.sshfl [vmem:[#allocation1 + $0x18] sm:$0xff pattern:$0x75316420]  ;;  %v95_v11 = vsel %vm80_vm0, %v74_v7, -inf }
  0x18   :  { %v96_v12 = vrot.slane %v95_v11, 4  ;;  %v102_v13 = vsel %vm80_vm0, %v75_v10, -inf }
  0x19   :  { %v83_v14 = vmax.f32 %v81_v5, %v82_v8  ;;  %v90_v15 = vmax.f32 %v88_v6, %v89_v9  ;;  %v103_v16 = vrot.slane %v102_v13, 4  ;;  %v252_v9 = vsel %vm214_vm3, %v198_v47, %v246_v57 }
  0x1a   :  { %v97_v17 = vmax.f32 %v95_v11, %v96_v12  ;;  %v249_v11 = vsel %vm208_vm5, %v198_v47, %v246_v57 }
  0x1b   :  { %v84_v18 = vrot.slane %v83_v14, 2  ;;  %v91_v19 = vrot.slane %v90_v15, 2  ;;  %v104_v20 = vmax.f32 %v102_v13, %v103_v16 }
  0x1c   :  { %v98_v21 = vrot.slane %v97_v17, 2 }
  0x1d   :  { %v85_v22 = vmax.f32 %v83_v14, %v84_v18  ;;  %v92_v23 = vmax.f32 %v90_v15, %v91_v19  ;;  %v105_v24 = vrot.slane %v104_v20, 2 }
  0x1e   :  { %v99_v25 = vmax.f32 %v97_v17, %v98_v21  ;;  %v200_v21 = vlaneseq }
  0x1f   :  { %v86_v26 = vrot.slane %v85_v22, 1  ;;  %v93_v27 = vrot.slane %v92_v23, 1  ;;  %v106_v28 = vmax.f32 %v104_v20, %v105_v24 }
  0x20   :  { %v100_v30 = vrot.slane %v99_v25, 1 }
  0x21   :  { %v94_v29 = vmax.f32 %v92_v23, %v93_v27  ;;  %v107_v31 = vrot.slane %v106_v28, 1  ;;  %v87_v32 = vmax.f32 %v85_v22, %v86_v26  ;;  %v531_v27 = vshrl.u32 %v200_v21, 7 }
  0x22   :  { %v101_v36 = vmax.f32 %v99_v25, %v100_v30  ;;  %v202_v30 = vsel %vm199_vm9, %v198_v47, 4294967295 }
  0x23   :  { %v113_v33 = vrot.slane %v94_v29, 4  ;;  %v108_v34 = vmax.f32 %v106_v28, %v107_v31 }
  0x25   :  { %v115_v35 = vsel %vm80_vm0, %v87_v32, %v113_v33  ;;  %v114_v37 = vrot.slane %v108_v34, 4 }
  0x26   :  { %v119_v38 = vsub.f32 %v65_v0, %v115_v35  ;;  %v248_v0 = vrot.slane %v198_v47, 3 }
  0x27   :  { %v116_v39 = vsel %vm80_vm0, %v101_v36, %v114_v37  ;;  %v205_v36 = vrot.slane %v202_v30, 1 }
  0x28   :  { %v121_v40 = vmul.f32 1.442695, %v119_v38  ;;  %v120_v41 = vsub.f32 %v66_v1, %v116_v39  ;;  %v253_v12 = vsel %vm216_vm4, %v247_v58, %v248_v0  ;;  %v250_v16 = vsel %vm210_vm6, %v247_v58, %v248_v0 }
  0x29   :  { %v251_v23 = vsel %vm212_vm8, %v249_v11, %v250_v16  ;;  %v254_v24 = vsel %vm218_vm7, %v252_v9, %v253_v12  ;;  %v206_v39 = vrot.slane %v202_v30, 2  ;;  %v209_v57 = vsel %vm208_vm5, %v202_v30, %v205_v36 }
  0x2a   :  { %349 = vpow2.f32 %v121_v40  ;;  %v123_v42 = vmul.f32 1.442695, %v120_v41  ;;  %v257_v28 = vperm.slane %v251_v23, 1  ;;  %v255_v29 = vrot.slane %v254_v24, 1 }
  0x2b   :  { %v256_v35 = vperm.slane %v251_v23, 0  ;;  %v207_v40 = vrot.slane %v202_v30, 3  ;;  %v289_v23 = vld [vmem:[#allocation8 + $0x4] sm:$0xf] }
  0x2c   :  { %351 = vpow2.f32 %v123_v42  ;;  %vm261_vm10 = vcmp.eq.s32.totalorder %v257_v28, %v531_v27  ;;  %v259_v32 = vperm.slane %v255_v29, 1  ;;  %v258_v45 = vperm.slane %v255_v29, 0 }
  0x2d   :  { %v265_v43 = vsel %vm261_vm10, 1.0, %v469_v2  ;;  %vm260_vm12 = vcmp.eq.s32.totalorder %v256_v35, %v531_v27 }
  0x2e   :  { %vm263_vm11 = vcmp.eq.s32.totalorder %v259_v32, %v531_v27  ;;  %vm262_vm13 = vcmp.eq.s32.totalorder %v258_v45, %v531_v27  ;;  %v280_v32 = vld [vmem:[#allocation7] sm:$0xf] }
  0x30   :  { %v513_v44 = vpop.eup %349 }
  0x31   :  { %127 = vst [vmem:[#allocation1] ss:$2 sm:$0xff] %v513_v44 }
  0x32   :  { %v517_v46 = vpop.eup %351 }
  0x33   :  { %131 = vst [vmem:[#allocation1 + $0x10] ss:$2 sm:$0xff] %v517_v46 }
  0x38   :  { %v128_v48 = vld.sshfl [vmem:[#allocation1] sm:$0xff pattern:$0x75316420]  ;;  %v129_v49 = vld.sshfl [vmem:[#allocation1 + $0x8] sm:$0xff pattern:$0x75316420] }
  0x39   :  { %v138_v50 = vsel %vm80_vm0, %v128_v48, 0.0  ;;  %v145_v51 = vsel %vm80_vm0, %v129_v49, 0.0 }
  0x3a   :  { %v139_v52 = vrot.slane %v138_v50, 4  ;;  %v146_v53 = vrot.slane %v145_v51, 4  ;;  %v132_v54 = vld.sshfl [vmem:[#allocation1 + $0x10] sm:$0xff pattern:$0x75316420] }
  0x3b   :  { %v133_v55 = vld.sshfl [vmem:[#allocation1 + $0x18] sm:$0xff pattern:$0x75316420]  ;;  %v152_v56 = vsel %vm80_vm0, %v132_v54, 0.0  ;;  %v217_v54 = vsel %vm216_vm4, %v206_v39, %v207_v40 }
  0x3c   :  { %v140_v59 = vadd.f32 %v139_v52, %v138_v50  ;;  %v147_v60 = vadd.f32 %v146_v53, %v145_v51  ;;  %v153_v61 = vrot.slane %v152_v56, 4  ;;  %v159_v62 = vsel %vm80_vm0, %v133_v55, 0.0 }
  0x3d   :  { %v160_v63 = vrot.slane %v159_v62, 4  ;;  %v215_v50 = vsel %vm214_vm3, %v202_v30, %v205_v36  ;;  %v272_v55 = vrot.slane %v265_v43, 4 }
  0x3e   :  { %v141_v1 = vrot.slane %v140_v59, 2  ;;  %v148_v3 = vrot.slane %v147_v60, 2  ;;  %v154_v4 = vadd.f32 %v153_v61, %v152_v56  ;;  %v267_v56 = vsel %vm263_vm11, 1.0, %v469_v2 }
  0x3f   :  { %v161_v5 = vadd.f32 %v160_v63, %v159_v62  ;;  %v211_v61 = vsel %vm210_vm6, %v206_v39, %v207_v40  ;;  %v264_v62 = vsel %vm260_vm12, 1.0, %v469_v2  ;;  %v219_v63 = vsel %vm218_vm7, %v215_v50, %v217_v54  ;;  %v281_v39 = vld [vmem:[#allocation7 + $0x4] sm:$0xf] }
  0x40   :  { %v142_v6 = vadd.f32 %v141_v1, %v140_v59  ;;  %v149_v7 = vadd.f32 %v148_v3, %v147_v60  ;;  %v155_v8 = vrot.slane %v154_v4, 2  ;;  %v274_v9 = vsel %vm80_vm0, %v264_v62, %v272_v55 }
  0x41   :  { %v162_v10 = vrot.slane %v161_v5, 2 }
  0x42   :  { %v143_v13 = vrot.slane %v142_v6, 1  ;;  %v150_v14 = vrot.slane %v149_v7, 1  ;;  %v156_v15 = vadd.f32 %v155_v8, %v154_v4  ;;  %v273_v4 = vrot.slane %v267_v56, 4 }
  0x43   :  { %v163_v17 = vadd.f32 %v162_v10, %v161_v5  ;;  %v220_v10 = vrot.slane %v219_v63, 1 }
  0x44   :  { %v144_v18 = vadd.f32 %v143_v13, %v142_v6  ;;  %v151_v19 = vadd.f32 %v150_v14, %v149_v7  ;;  %v157_v20 = vrot.slane %v156_v15, 1  ;;  %v266_v6 = vsel %vm262_vm13, 1.0, %v469_v2 }
  0x45   :  { %v164_v22 = vrot.slane %v163_v17, 1  ;;  %v213_v7 = vsel %vm212_vm8, %v209_v57, %v211_v61  ;;  %v275_v13 = vsel %vm80_vm0, %v266_v6, %v273_v4  ;;  %v224_v2 = vperm.slane %v220_v10, 1 }
  0x46   :  { %353 = vrcp.f32 %v144_v18  ;;  %v158_v25 = vadd.f32 %v157_v20, %v156_v15  ;;  %v221_v14 = vperm.slane %v213_v7, 0  ;;  %v222_v15 = vperm.slane %v213_v7, 1  ;;  %v288_v20 = vld [vmem:[#allocation8] sm:$0xf] }
  0x47   :  { %355 = vrcp.f32 %v151_v19  ;;  %v165_v26 = vadd.f32 %v164_v22, %v163_v17  ;;  %v223_v17 = vperm.slane %v220_v10, 0  ;;  %vm228_vm1 = vcmp.eq.s32.totalorder %v224_v2, %v531_v27 }
  0x48   :  { %357 = vrcp.f32 %v158_v25  ;;  %vm554_vm14 = vcmp.eq.s32.totalorder %v221_v14, %v531_v27  ;;  %vm559_vm15 = vcmp.eq.s32.totalorder %v222_v15, %v531_v27 }
  0x49   :  { %359 = vrcp.f32 %v165_v26 }
  0x4c   :  { %v354_v31 = vpop.eup %353 }
  0x4d   :  { %v356_v33 = vpop.eup %355  ;;  %v170_v34 = vmul.f32 %v354_v31, %v144_v18 }
  0x4e   :  { %v358_v37 = vpop.eup %357  ;;  %v171_v38 = vmul.f32 %v356_v33, %v151_v19 }
  0x4f   :  { %v360_v41 = vpop.eup %359  ;;  %v172_v42 = vmul.f32 %v358_v37, %v158_v25  ;;  %v174_v48 = vsub.f32 2.0, %v170_v34 }
  0x50   :  { %v175_v49 = vsub.f32 2.0, %v171_v38  ;;  %v173_v47 = vmul.f32 %v360_v41, %v165_v26 }
  0x51   :  { %v176_v52 = vsub.f32 2.0, %v172_v42  ;;  %v178_v58 = vmul.f32 %v354_v31, %v174_v48 }
  0x52   :  { %v179_v51 = vmul.f32 %v356_v33, %v175_v49  ;;  %v177_v53 = vsub.f32 2.0, %v173_v47 }
  0x53   :  { %v180_v1 = vmul.f32 %v358_v37, %v176_v52 }
  0x54   :  { %v186_v59 = vrot.slane %v179_v51, 4  ;;  %v181_v60 = vmul.f32 %v360_v41, %v177_v53 }
  0x56   :  { %v188_v0 = vsel %vm80_vm0, %v178_v58, %v186_v59  ;;  %v187_v3 = vrot.slane %v181_v60, 4 }
  0x57   :  { %v192_v5 = vmul.f32 %v513_v44, %v188_v0 }
  0x58   :  { %v189_v8 = vsel %vm80_vm0, %v180_v1, %v187_v3  ;;  %vm227_vm0 = vcmp.eq.s32.totalorder %v223_v17, %v531_v27 }
  0x59   :  { %231 = vst [vmem:[#allocation1] ss:$2 sm:$0xff] %v192_v5  ;;  %v193_v11 = vmul.f32 %v517_v46, %v189_v8  ;;  %v203_v12 = vmul.f32 %v192_v5, %v192_v5 }
  0x5b   :  { %235 = vst [vmem:[#allocation1 + $0x10] ss:$2 sm:$0xff] %v193_v11  ;;  %v278_v16 = vadd.f32 %v274_v9, %v203_v12  ;;  %v204_v44 = vmul.f32 %v193_v11, %v193_v11 }
  0x5d   :  { %v292_v18 = vrot.slane %v278_v16, 4  ;;  %v279_v19 = vadd.f32 %v275_v13, %v204_v44 }
  0x5f   :  { %v296_v22 = vadd.f32 %v292_v18, %v278_v16  ;;  %v293_v24 = vrot.slane %v279_v19, 4 }
  0x60   :  { %v232_v25 = vld.sshfl [vmem:[#allocation1] sm:$0xff pattern:$0x75316420]  ;;  %v233_v26 = vld.sshfl [vmem:[#allocation1 + $0x8] sm:$0xff pattern:$0x75316420] }
  0x61   :  { %v298_v28 = vadd.f32 %v296_v22, %v288_v20  ;;  %v297_v29 = vadd.f32 %v293_v24, %v279_v19  ;;  %v242_v30 = vsel %vm554_vm14, %v232_v25, 0.0  ;;  %v243_v31 = vsel %vm559_vm15, %v233_v26, 0.0 }
  0x62   :  { %v282_v33 = vadd.f32 %v243_v31, %v242_v30  ;;  %v236_v34 = vld.sshfl [vmem:[#allocation1 + $0x10] sm:$0xff pattern:$0x75316420]  ;;  %v237_v35 = vld.sshfl [vmem:[#allocation1 + $0x18] sm:$0xff pattern:$0x75316420] }
  0x63   :  { %300 = vst [vmem:[#allocation8] sm:$0xf] %v298_v28  ;;  %v299_v36 = vadd.f32 %v297_v29, %v289_v23  ;;  %v244_v37 = vsel %vm227_vm0, %v236_v34, 0.0  ;;  %v245_v38 = vsel %vm228_vm1, %v237_v35, 0.0 }
  0x64   :  { %v284_v27 = vadd.f32 %v282_v33, %v280_v32  ;;  %v283_v40 = vadd.f32 %v245_v38, %v244_v37 }
  0x65   :  { %301 = vst [vmem:[#allocation8 + $0x4] sm:$0xf] %v299_v36 }
  0x66   :  { %286 = vst [vmem:[#allocation7] sm:$0xf] %v284_v27  ;;  %v285_v41 = vadd.f32 %v283_v40, %v281_v39  ;;  %327 = dma.vmem_to_hbm [thread:$0]  %s320_s28, 128, %s322_s4, [#allocation9], %s472_s6, %s472_s6, %s473_s7  }
  0x68   :  { %287 = vst [vmem:[#allocation7 + $0x4] sm:$0xf] %v285_v41 }
  0x69   :  { %314 = dma.vmem_to_hbm [thread:$0]  %s307_s1, 128, %s309_s26, [#allocation4], %s472_s6, %s472_s6, %s473_s7  }
  0x6a   :  { %461 = dma.done.wait [#allocation4], 128  }
  0x6b   :  { %462 = vsyncadd [#allocation4], 4294967168 }
  0x6c   :  { %463 = dma.done.wait [#allocation9], 128  }
  0x6d   :  { %464 = vsyncadd [#allocation9], 4294967168 }
  0x6e   :  { %336 = vsyncpa [#allocation3], 1 }
  0x6f   :  { %337 = vsyncpa [#allocation6], 1 }
  0x70   :  { %338 = vsyncpa [#allocation4], 1 }
  0x71   :  { %339 = vsyncpa [#allocation9], 1 }

</bundles_post_ra>
